<compile_context>
chip_gen: v6e
topology: v6e:2x2x1
jax: 0.10.0
libtpu: 0.0.40
codegen_flags: <defaults>
</compile_context>

<pallas_src>
import math
import jax
import jax.numpy as jnp
from jax import lax
from jax.experimental import pallas as pl
from jax.experimental.pallas import tpu as pltpu

# ---- small ModelArgs-consistent config ----
DIM = 32                       # args.dim
N_HEADS = 4                    # args.n_heads
N_KV_HEADS = 2                 # args.n_kv_heads
HEAD_DIM = DIM // N_HEADS      # 8
N_REP = N_HEADS // N_KV_HEADS  # 2
QD = N_HEADS * HEAD_DIM        # 32
KVD = N_KV_HEADS * HEAD_DIM    # 16
L2_EPS = 1e-6
MAX_BATCH = 4
MAX_SEQ = 16
# use_qk_norm is True because DIM <= 4096


def _l2norm(x, eps=L2_EPS):
    # L2Norm._norm: x * rsqrt(mean(x^2, -1) + eps)
    return x * lax.rsqrt(jnp.mean(x * x, axis=-1, keepdims=True) + eps)


def make_attention_kernel(B, S, P):
    """Build the whole-problem kernel. B batches, S new tokens, P cache-prefix length."""
    T = P + S
    inv_hd = 1.0 / float(HEAD_DIM)
    q_scale = 1.0 / math.sqrt(HEAD_DIM)   # folded into the Q norm scale

    def kernel(x_ref, xT_ref, wq_ref, wk_ref, wv_ref, wo_ref,
               ckT_ref, cv_ref, selq_ref, selqT_ref, selkT_ref, selk_ref,
               o_ref, k_scr, v_scr, attn_scr):
        x = x_ref[...]            # (B*S, DIM)
        xT = xT_ref[...]          # (DIM, B*S)

        # ---- projections for all batches at once (MXU) ----
        xq = jnp.dot(x, wq_ref[...], preferred_element_type=jnp.float32)     # (B*S, QD)
        xv = jnp.dot(x, wv_ref[...], preferred_element_type=jnp.float32)     # (B*S, KVD)
        # K produced directly transposed: k^T = Wk @ x^T  (scores then need no K transpose)
        kT = jnp.dot(wk_ref[...], xT, preferred_element_type=jnp.float32)    # (KVD, B*S)

        # ---- QK L2 norm via block-diagonal selector matmuls (MXU + EUP, no per-head reduces) ----
        ssq = jnp.dot(xq * xq, selq_ref[...], preferred_element_type=jnp.float32)    # (B*S, H)
        qsc = lax.rsqrt(ssq * inv_hd + L2_EPS) * q_scale                               # rsqrt on EUP
        xq_n = xq * jnp.dot(qsc, selqT_ref[...], preferred_element_type=jnp.float32)  # (B*S, QD), pre-scaled by 1/sqrt(hd)

        ssk = jnp.dot(selkT_ref[...], kT * kT, preferred_element_type=jnp.float32)    # (Hkv, B*S)
        ksc = lax.rsqrt(ssk * inv_hd + L2_EPS)
        kT_n = kT * jnp.dot(selk_ref[...], ksc, preferred_element_type=jnp.float32)   # (KVD, B*S)

        # ---- assemble (new tokens + cache prefix) K/V into VMEM scratch, no concatenates ----
        # Key/value order along T does not change softmax/PV, so the new block goes first
        # (aligned to lane/sublane offsets 0), the prefix after it.
        for b in range(B):
            k_scr[b, :, 0:S] = kT_n[:, b * S:(b + 1) * S]        # (KVD, S) new keys (normalized)
            v_scr[b, 0:S, :] = xv[b * S:(b + 1) * S, :]          # (S, KVD) new values
            if P > 0:
                k_scr[b, :, S:T] = ckT_ref[b]                    # (KVD, P) cache prefix (as-is)
                v_scr[b, S:T, :] = cv_ref[b]                     # (P, KVD)

        # ---- attention: one scores/softmax/PV block per (batch, kv-group) ----
        for b in range(B):
            for g in range(N_KV_HEADS):
                # stack the N_REP query heads of this group along rows (S is a multiple of 8,
                # so this is an aligned sublane-tile concat)
                q_stack = jnp.concatenate(
                    [xq_n[b * S:(b + 1) * S,
                          (g * N_REP + r) * HEAD_DIM:(g * N_REP + r + 1) * HEAD_DIM]
                     for r in range(N_REP)],
                    axis=0)                                                        # (N_REP*S, hd)

                kT_bg = k_scr[b, g * HEAD_DIM:(g + 1) * HEAD_DIM, :]               # (hd, T)
                v_bg = v_scr[b, :, g * HEAD_DIM:(g + 1) * HEAD_DIM]                # (T, hd)

                scores = jnp.dot(q_stack, kT_bg,
                                 preferred_element_type=jnp.float32)               # (N_REP*S, T)
                m = jnp.max(scores, axis=-1, keepdims=True)
                p = jnp.exp(scores - m)
                p = p / jnp.sum(p, axis=-1, keepdims=True)
                pv = jnp.dot(p, v_bg, preferred_element_type=jnp.float32)          # (N_REP*S, hd)

                for r in range(N_REP):
                    h = g * N_REP + r
                    attn_scr[b * S:(b + 1) * S,
                             h * HEAD_DIM:(h + 1) * HEAD_DIM] = pv[r * S:(r + 1) * S, :]

        # ---- single output projection over all batches ----
        o_ref[...] = jnp.dot(attn_scr[...], wo_ref[...], preferred_element_type=jnp.float32)

    return kernel


def self_attention_pallas(x, wq, wk, wv, wo, cache_k, cache_v, start_pos):
    """x: (B, S, DIM); wq/wk/wv/wo in PyTorch (out, in) layout; cache_*: (MAX_BATCH, MAX_SEQ, Hkv, hd)."""
    B, S, D = x.shape
    P = int(start_pos)
    T = P + S
    N = B * S
    assert P > 0, "demo uses a non-empty cache prefix"

    # glue (outside the kernel): flatten batch into rows, pre-transpose what the kernel consumes.
    x_flat = x.reshape(N, D)
    xT = x_flat.T                                    # (D, N) for the transposed K projection
    wq_t = wq.T                                      # (D, QD)
    wv_t = wv.T                                      # (D, KVD)
    wo_t = wo.T                                      # (QD, D)
    # wk stays (KVD, D): kernel computes k^T = wk @ x^T directly.

    ck_pre = cache_k[:B, :P].reshape(B, P, KVD)
    ckT = jnp.transpose(ck_pre, (0, 2, 1))           # (B, KVD, P) keys stored pre-transposed
    cv_pre = cache_v[:B, :P].reshape(B, P, KVD)      # (B, P, KVD)

    # 0/1 block-diagonal selectors: one matmul computes all per-head sums of squares.
    selq = (jnp.arange(QD)[:, None] // HEAD_DIM
            == jnp.arange(N_HEADS)[None, :]).astype(jnp.float32)       # (QD, H)
    selqT = selq.T                                                      # (H, QD)
    selk = (jnp.arange(KVD)[:, None] // HEAD_DIM
            == jnp.arange(N_KV_HEADS)[None, :]).astype(jnp.float32)     # (KVD, Hkv)
    selkT = selk.T                                                      # (Hkv, KVD)

    kernel = make_attention_kernel(B, S, P)
    vmem = pltpu.MemorySpace.VMEM

    out_flat = pl.pallas_call(
        kernel,
        out_shape=jax.ShapeDtypeStruct((N, D), jnp.float32),
        in_specs=[pl.BlockSpec(memory_space=vmem)] * 12,
        out_specs=pl.BlockSpec(memory_space=vmem),
        scratch_shapes=[
            pltpu.VMEM((B, KVD, T), jnp.float32),    # transposed keys: new + cache prefix
            pltpu.VMEM((B, T, KVD), jnp.float32),    # values: new + cache prefix
            pltpu.VMEM((N, QD), jnp.float32),        # per-head attention outputs
        ],
    )(x_flat, xT, wq_t, wk, wv_t, wo_t, ckT, cv_pre, selq, selqT, selkT, selk)
    return out_flat.reshape(B, S, D)


def self_attention_ref(x, wq, wk, wv, wo, cache_k, cache_v, start_pos):
    """Pure-JAX reference mirroring the PyTorch forward exactly."""
    B, S, D = x.shape
    xq = x @ wq.T
    xk = x @ wk.T
    xv = x @ wv.T
    xq = xq.reshape(B, S, N_HEADS, HEAD_DIM)
    xk = xk.reshape(B, S, N_KV_HEADS, HEAD_DIM)
    xv = xv.reshape(B, S, N_KV_HEADS, HEAD_DIM)
    xq = _l2norm(xq)
    xk = _l2norm(xk)
    cache_k = cache_k.at[:B, start_pos:start_pos + S].set(xk)
    cache_v = cache_v.at[:B, start_pos:start_pos + S].set(xv)
    keys = cache_k[:B, :start_pos + S]
    values = cache_v[:B, :start_pos + S]
    keys = jnp.repeat(keys, N_REP, axis=2)       # repeat_kv
    values = jnp.repeat(values, N_REP, axis=2)
    q = jnp.transpose(xq, (0, 2, 1, 3))          # (B, Hq, S, hd)
    k = jnp.transpose(keys, (0, 2, 1, 3))        # (B, Hq, T, hd)
    v = jnp.transpose(values, (0, 2, 1, 3))
    scores = jnp.einsum("bhqd,bhkd->bhqk", q, k) / math.sqrt(HEAD_DIM)
    scores = jax.nn.softmax(scores, axis=-1)
    out = jnp.einsum("bhqk,bhkd->bhqd", scores, v)
    out = jnp.transpose(out, (0, 2, 1, 3)).reshape(B, S, -1)
    return out @ wo.T


if __name__ == "__main__":
    B, S, START_POS = 2, 8, 4

    key = jax.random.PRNGKey(0)
    kx, k1, k2, k3, k4 = jax.random.split(key, 5)

    # nn.Linear(bias=False)-style init: U(-1/sqrt(in), 1/sqrt(in)), PyTorch (out, in) layout
    def linear_w(k, out_f, in_f):
        bound = 1.0 / math.sqrt(in_f)
        return jax.random.uniform(k, (out_f, in_f), jnp.float32, -bound, bound)

    x = jax.random.normal(kx, (B, S, DIM), jnp.float32)
    wq = linear_w(k1, QD, DIM)
    wk = linear_w(k2, KVD, DIM)
    wv = linear_w(k3, KVD, DIM)
    wo = linear_w(k4, DIM, QD)
    cache_k = jnp.zeros((MAX_BATCH, MAX_SEQ, N_KV_HEADS, HEAD_DIM), jnp.float32)
    cache_v = jnp.zeros((MAX_BATCH, MAX_SEQ, N_KV_HEADS, HEAD_DIM), jnp.float32)

    # TODO(synk): freqs_complex is accepted by the PyTorch forward but never used (no RoPE is
    # applied), and the in-place cache buffer update is a module side effect not returned by
    # forward; both are intentionally omitted here.

    out = self_attention_pallas(x, wq, wk, wv, wo, cache_k, cache_v, START_POS)
    out = jax.block_until_ready(out)

    ref = self_attention_ref(x, wq, wk, wv, wo, cache_k, cache_v, START_POS)
    assert out.shape == (B, S, DIM)
    err = float(jnp.max(jnp.abs(out - ref)))
    assert jnp.allclose(out, ref, rtol=2e-5, atol=2e-5), err

    print("KERNEL_OK")
</pallas_src>

<mosaic_0001>
module attributes {stable_mosaic.version = 11 : i64} {
  func.func @kernel(%arg0: memref<16x32xf32, #tpu.memory_space<vmem>>, %arg1: memref<32x16xf32, #tpu.memory_space<vmem>>, %arg2: memref<32x32xf32, #tpu.memory_space<vmem>>, %arg3: memref<16x32xf32, #tpu.memory_space<vmem>>, %arg4: memref<32x16xf32, #tpu.memory_space<vmem>>, %arg5: memref<32x32xf32, #tpu.memory_space<vmem>>, %arg6: memref<2x16x4xf32, #tpu.memory_space<vmem>>, %arg7: memref<2x4x16xf32, #tpu.memory_space<vmem>>, %arg8: memref<32x4xf32, #tpu.memory_space<vmem>>, %arg9: memref<4x32xf32, #tpu.memory_space<vmem>>, %arg10: memref<2x16xf32, #tpu.memory_space<vmem>>, %arg11: memref<16x2xf32, #tpu.memory_space<vmem>>, %arg12: memref<16x32xf32, #tpu.memory_space<vmem>>, %arg13: memref<2x16x12xf32, #tpu.memory_space<vmem>>, %arg14: memref<2x12x16xf32, #tpu.memory_space<vmem>>, %arg15: memref<16x32xf32, #tpu.memory_space<vmem>>) attributes {dimension_semantics = [], scalar_prefetch = 0 : i64, scratch_operands = 3 : i64, tpu.core_type = #tpu.core_type<tc>} {
    %c0 = arith.constant 0 : index
    %c0_0 = arith.constant 0 : index
    %0 = vector.load %arg0[%c0, %c0_0] : memref<16x32xf32, #tpu.memory_space<vmem>>, vector<16x32xf32>
    %c0_1 = arith.constant 0 : index
    %c0_2 = arith.constant 0 : index
    %1 = vector.load %arg1[%c0_1, %c0_2] : memref<32x16xf32, #tpu.memory_space<vmem>>, vector<32x16xf32>
    %c0_3 = arith.constant 0 : index
    %c0_4 = arith.constant 0 : index
    %2 = vector.load %arg2[%c0_3, %c0_4] : memref<32x32xf32, #tpu.memory_space<vmem>>, vector<32x32xf32>
    %cst = arith.constant dense<0.000000e+00> : vector<16x32xf32>
    %3 = tpu.matmul %0, %2, %cst {dimension_numbers = #tpu.dot_dimension_numbers<[1], [0], [0], [1], [0, 0, 1, 1], [], []>} : vector<16x32xf32>, vector<32x32xf32>, vector<16x32xf32> -> vector<16x32xf32>
    %c0_5 = arith.constant 0 : index
    %c0_6 = arith.constant 0 : index
    %4 = vector.load %arg4[%c0_5, %c0_6] : memref<32x16xf32, #tpu.memory_space<vmem>>, vector<32x16xf32>
    %cst_7 = arith.constant dense<0.000000e+00> : vector<16x16xf32>
    %5 = tpu.matmul %0, %4, %cst_7 {dimension_numbers = #tpu.dot_dimension_numbers<[1], [0], [0], [1], [0, 0, 1, 1], [], []>} : vector<16x32xf32>, vector<32x16xf32>, vector<16x16xf32> -> vector<16x16xf32>
    %c0_8 = arith.constant 0 : index
    %c0_9 = arith.constant 0 : index
    %6 = vector.load %arg3[%c0_8, %c0_9] : memref<16x32xf32, #tpu.memory_space<vmem>>, vector<16x32xf32>
    %cst_10 = arith.constant dense<0.000000e+00> : vector<16x16xf32>
    %7 = tpu.matmul %6, %1, %cst_10 {dimension_numbers = #tpu.dot_dimension_numbers<[1], [0], [0], [1], [0, 0, 1, 1], [], []>} : vector<16x32xf32>, vector<32x16xf32>, vector<16x16xf32> -> vector<16x16xf32>
    %8 = arith.mulf %3, %3 : vector<16x32xf32>
    %c0_11 = arith.constant 0 : index
    %c0_12 = arith.constant 0 : index
    %9 = vector.load %arg8[%c0_11, %c0_12] : memref<32x4xf32, #tpu.memory_space<vmem>>, vector<32x4xf32>
    %cst_13 = arith.constant dense<0.000000e+00> : vector<16x4xf32>
    %10 = tpu.matmul %8, %9, %cst_13 {dimension_numbers = #tpu.dot_dimension_numbers<[1], [0], [0], [1], [0, 0, 1, 1], [], []>} : vector<16x32xf32>, vector<32x4xf32>, vector<16x4xf32> -> vector<16x4xf32>
    %cst_14 = arith.constant 1.250000e-01 : f32
    %11 = vector.broadcast %cst_14 : f32 to vector<16x4xf32>
    %12 = arith.mulf %10, %11 : vector<16x4xf32>
    %cst_15 = arith.constant 9.99999997E-7 : f32
    %13 = vector.broadcast %cst_15 : f32 to vector<16x4xf32>
    %14 = arith.addf %12, %13 : vector<16x4xf32>
    %15 = math.rsqrt %14 : vector<16x4xf32>
    %cst_16 = arith.constant 0.353553385 : f32
    %16 = vector.broadcast %cst_16 : f32 to vector<16x4xf32>
    %17 = arith.mulf %15, %16 : vector<16x4xf32>
    %c0_17 = arith.constant 0 : index
    %c0_18 = arith.constant 0 : index
    %18 = vector.load %arg9[%c0_17, %c0_18] : memref<4x32xf32, #tpu.memory_space<vmem>>, vector<4x32xf32>
    %cst_19 = arith.constant dense<0.000000e+00> : vector<16x32xf32>
    %19 = tpu.matmul %17, %18, %cst_19 {dimension_numbers = #tpu.dot_dimension_numbers<[1], [0], [0], [1], [0, 0, 1, 1], [], []>} : vector<16x4xf32>, vector<4x32xf32>, vector<16x32xf32> -> vector<16x32xf32>
    %20 = arith.mulf %3, %19 : vector<16x32xf32>
    %c0_20 = arith.constant 0 : index
    %c0_21 = arith.constant 0 : index
    %21 = vector.load %arg10[%c0_20, %c0_21] : memref<2x16xf32, #tpu.memory_space<vmem>>, vector<2x16xf32>
    %22 = arith.mulf %7, %7 : vector<16x16xf32>
    %cst_22 = arith.constant dense<0.000000e+00> : vector<2x16xf32>
    %23 = tpu.matmul %21, %22, %cst_22 {dimension_numbers = #tpu.dot_dimension_numbers<[1], [0], [0], [1], [0, 0, 1, 1], [], []>} : vector<2x16xf32>, vector<16x16xf32>, vector<2x16xf32> -> vector<2x16xf32>
    %cst_23 = arith.constant 1.250000e-01 : f32
    %24 = vector.broadcast %cst_23 : f32 to vector<2x16xf32>
    %25 = arith.mulf %23, %24 : vector<2x16xf32>
    %cst_24 = arith.constant 9.99999997E-7 : f32
    %26 = vector.broadcast %cst_24 : f32 to vector<2x16xf32>
    %27 = arith.addf %25, %26 : vector<2x16xf32>
    %28 = math.rsqrt %27 : vector<2x16xf32>
    %c0_25 = arith.constant 0 : index
    %c0_26 = arith.constant 0 : index
    %29 = vector.load %arg11[%c0_25, %c0_26] : memref<16x2xf32, #tpu.memory_space<vmem>>, vector<16x2xf32>
    %cst_27 = arith.constant dense<0.000000e+00> : vector<16x16xf32>
    %30 = tpu.matmul %29, %28, %cst_27 {dimension_numbers = #tpu.dot_dimension_numbers<[1], [0], [0], [1], [0, 0, 1, 1], [], []>} : vector<16x2xf32>, vector<2x16xf32>, vector<16x16xf32> -> vector<16x16xf32>
    %31 = arith.mulf %7, %30 : vector<16x16xf32>
    %32 = vector.extract_strided_slice %31 {offsets = [0, 0], sizes = [16, 8], strides = [1, 1]} : vector<16x16xf32> to vector<16x8xf32>
    %c0_28 = arith.constant 0 : index
    %c0_29 = arith.constant 0 : index
    %c0_30 = arith.constant 0 : index
    %33 = vector.load %arg13[%c0_28, %c0_29, %c0_30] : memref<2x16x12xf32, #tpu.memory_space<vmem>>, vector<1x16x8xf32>
    %34 = vector.shape_cast %33 : vector<1x16x8xf32> to vector<16x8xf32>
    %35 = vector.shape_cast %32 : vector<16x8xf32> to vector<1x16x8xf32>
    tpu.vector_store %arg13[%c0_28, %c0_29, %c0_30], %35 {strides = array<i32>} : memref<2x16x12xf32, #tpu.memory_space<vmem>>, vector<1x16x8xf32>,
    %36 = vector.extract_strided_slice %5 {offsets = [0, 0], sizes = [8, 16], strides = [1, 1]} : vector<16x16xf32> to vector<8x16xf32>
    %c0_31 = arith.constant 0 : index
    %c0_32 = arith.constant 0 : index
    %c0_33 = arith.constant 0 : index
    %37 = vector.load %arg14[%c0_31, %c0_32, %c0_33] : memref<2x12x16xf32, #tpu.memory_space<vmem>>, vector<1x8x16xf32>
    %38 = vector.shape_cast %37 : vector<1x8x16xf32> to vector<8x16xf32>
    %39 = vector.shape_cast %36 : vector<8x16xf32> to vector<1x8x16xf32>
    tpu.vector_store %arg14[%c0_31, %c0_32, %c0_33], %39 {strides = array<i32>} : memref<2x12x16xf32, #tpu.memory_space<vmem>>, vector<1x8x16xf32>,
    %c0_34 = arith.constant 0 : index
    %c0_35 = arith.constant 0 : index
    %c0_36 = arith.constant 0 : index
    %40 = vector.load %arg6[%c0_34, %c0_35, %c0_36] : memref<2x16x4xf32, #tpu.memory_space<vmem>>, vector<1x16x4xf32>
    %41 = vector.shape_cast %40 : vector<1x16x4xf32> to vector<16x4xf32>
    %c0_37 = arith.constant 0 : index
    %c0_38 = arith.constant 0 : index
    %c8 = arith.constant 8 : index
    %42 = vector.load %arg13[%c0_37, %c0_38, %c8] : memref<2x16x12xf32, #tpu.memory_space<vmem>>, vector<1x16x4xf32>
    %43 = vector.shape_cast %42 : vector<1x16x4xf32> to vector<16x4xf32>
    %44 = vector.shape_cast %41 : vector<16x4xf32> to vector<1x16x4xf32>
    tpu.vector_store %arg13[%c0_37, %c0_38, %c8], %44 {strides = array<i32>} : memref<2x16x12xf32, #tpu.memory_space<vmem>>, vector<1x16x4xf32>,
    %c0_39 = arith.constant 0 : index
    %c0_40 = arith.constant 0 : index
    %c0_41 = arith.constant 0 : index
    %45 = vector.load %arg7[%c0_39, %c0_40, %c0_41] : memref<2x4x16xf32, #tpu.memory_space<vmem>>, vector<1x4x16xf32>
    %46 = vector.shape_cast %45 : vector<1x4x16xf32> to vector<4x16xf32>
    %c0_42 = arith.constant 0 : index
    %c8_43 = arith.constant 8 : index
    %c0_44 = arith.constant 0 : index
    %47 = vector.load %arg14[%c0_42, %c8_43, %c0_44] : memref<2x12x16xf32, #tpu.memory_space<vmem>>, vector<1x4x16xf32>
    %48 = vector.shape_cast %47 : vector<1x4x16xf32> to vector<4x16xf32>
    %49 = vector.shape_cast %46 : vector<4x16xf32> to vector<1x4x16xf32>
    tpu.vector_store %arg14[%c0_42, %c8_43, %c0_44], %49 {strides = array<i32>} : memref<2x12x16xf32, #tpu.memory_space<vmem>>, vector<1x4x16xf32>,
    %50 = vector.extract_strided_slice %31 {offsets = [0, 8], sizes = [16, 8], strides = [1, 1]} : vector<16x16xf32> to vector<16x8xf32>
    %c1 = arith.constant 1 : index
    %c0_45 = arith.constant 0 : index
    %c0_46 = arith.constant 0 : index
    %51 = vector.load %arg13[%c1, %c0_45, %c0_46] : memref<2x16x12xf32, #tpu.memory_space<vmem>>, vector<1x16x8xf32>
    %52 = vector.shape_cast %51 : vector<1x16x8xf32> to vector<16x8xf32>
    %53 = vector.shape_cast %50 : vector<16x8xf32> to vector<1x16x8xf32>
    tpu.vector_store %arg13[%c1, %c0_45, %c0_46], %53 {strides = array<i32>} : memref<2x16x12xf32, #tpu.memory_space<vmem>>, vector<1x16x8xf32>,
    %54 = vector.extract_strided_slice %5 {offsets = [8, 0], sizes = [8, 16], strides = [1, 1]} : vector<16x16xf32> to vector<8x16xf32>
    %c1_47 = arith.constant 1 : index
    %c0_48 = arith.constant 0 : index
    %c0_49 = arith.constant 0 : index
    %55 = vector.load %arg14[%c1_47, %c0_48, %c0_49] : memref<2x12x16xf32, #tpu.memory_space<vmem>>, vector<1x8x16xf32>
    %56 = vector.shape_cast %55 : vector<1x8x16xf32> to vector<8x16xf32>
    %57 = vector.shape_cast %54 : vector<8x16xf32> to vector<1x8x16xf32>
    tpu.vector_store %arg14[%c1_47, %c0_48, %c0_49], %57 {strides = array<i32>} : memref<2x12x16xf32, #tpu.memory_space<vmem>>, vector<1x8x16xf32>,
    %c1_50 = arith.constant 1 : index
    %c0_51 = arith.constant 0 : index
    %c0_52 = arith.constant 0 : index
    %58 = vector.load %arg6[%c1_50, %c0_51, %c0_52] : memref<2x16x4xf32, #tpu.memory_space<vmem>>, vector<1x16x4xf32>
    %59 = vector.shape_cast %58 : vector<1x16x4xf32> to vector<16x4xf32>
    %c1_53 = arith.constant 1 : index
    %c0_54 = arith.constant 0 : index
    %c8_55 = arith.constant 8 : index
    %60 = vector.load %arg13[%c1_53, %c0_54, %c8_55] : memref<2x16x12xf32, #tpu.memory_space<vmem>>, vector<1x16x4xf32>
    %61 = vector.shape_cast %60 : vector<1x16x4xf32> to vector<16x4xf32>
    %62 = vector.shape_cast %59 : vector<16x4xf32> to vector<1x16x4xf32>
    tpu.vector_store %arg13[%c1_53, %c0_54, %c8_55], %62 {strides = array<i32>} : memref<2x16x12xf32, #tpu.memory_space<vmem>>, vector<1x16x4xf32>,
    %c1_56 = arith.constant 1 : index
    %c0_57 = arith.constant 0 : index
    %c0_58 = arith.constant 0 : index
    %63 = vector.load %arg7[%c1_56, %c0_57, %c0_58] : memref<2x4x16xf32, #tpu.memory_space<vmem>>, vector<1x4x16xf32>
    %64 = vector.shape_cast %63 : vector<1x4x16xf32> to vector<4x16xf32>
    %c1_59 = arith.constant 1 : index
    %c8_60 = arith.constant 8 : index
    %c0_61 = arith.constant 0 : index
    %65 = vector.load %arg14[%c1_59, %c8_60, %c0_61] : memref<2x12x16xf32, #tpu.memory_space<vmem>>, vector<1x4x16xf32>
    %66 = vector.shape_cast %65 : vector<1x4x16xf32> to vector<4x16xf32>
    %67 = vector.shape_cast %64 : vector<4x16xf32> to vector<1x4x16xf32>
    tpu.vector_store %arg14[%c1_59, %c8_60, %c0_61], %67 {strides = array<i32>} : memref<2x12x16xf32, #tpu.memory_space<vmem>>, vector<1x4x16xf32>,
    %68 = vector.extract_strided_slice %20 {offsets = [0, 0], sizes = [8, 8], strides = [1, 1]} : vector<16x32xf32> to vector<8x8xf32>
    %69 = vector.extract_strided_slice %20 {offsets = [0, 8], sizes = [8, 8], strides = [1, 1]} : vector<16x32xf32> to vector<8x8xf32>
    %70 = tpu.concatenate %68, %69 in 0 : vector<8x8xf32>, vector<8x8xf32> -> vector<16x8xf32>
    %c0_62 = arith.constant 0 : index
    %c0_63 = arith.constant 0 : index
    %c0_64 = arith.constant 0 : index
    %71 = vector.load %arg13[%c0_62, %c0_63, %c0_64] : memref<2x16x12xf32, #tpu.memory_space<vmem>>, vector<1x8x12xf32>
    %72 = vector.shape_cast %71 : vector<1x8x12xf32> to vector<8x12xf32>
    %c0_65 = arith.constant 0 : index
    %c0_66 = arith.constant 0 : index
    %c0_67 = arith.constant 0 : index
    %73 = vector.load %arg14[%c0_65, %c0_66, %c0_67] : memref<2x12x16xf32, #tpu.memory_space<vmem>>, vector<1x12x8xf32>
    %74 = vector.shape_cast %73 : vector<1x12x8xf32> to vector<12x8xf32>
    %cst_68 = arith.constant dense<0.000000e+00> : vector<16x12xf32>
    %75 = tpu.matmul %70, %72, %cst_68 {dimension_numbers = #tpu.dot_dimension_numbers<[1], [0], [0], [1], [0, 0, 1, 1], [], []>} : vector<16x8xf32>, vector<8x12xf32>, vector<16x12xf32> -> vector<16x12xf32>
    %cst_69 = arith.constant dense<0xFF800000> : vector<16xf32>
    %76 = vector.multi_reduction <maximumf>, %75, %cst_69 [1] : vector<16x12xf32> to vector<16xf32>
    %77 = vector.shape_cast %76 : vector<16xf32> to vector<16x1xf32>
    %78 = vector.broadcast %77 : vector<16x1xf32> to vector<16x12xf32>
    %79 = arith.subf %75, %78 : vector<16x12xf32>
    %80 = math.exp %79 : vector<16x12xf32>
    %cst_70 = arith.constant dense<0.000000e+00> : vector<16xf32>
    %81 = vector.multi_reduction <add>, %80, %cst_70 [1] : vector<16x12xf32> to vector<16xf32>
    %82 = vector.shape_cast %81 : vector<16xf32> to vector<16x1xf32>
    %83 = vector.broadcast %82 : vector<16x1xf32> to vector<16x12xf32>
    %84 = arith.divf %80, %83 : vector<16x12xf32>
    %cst_71 = arith.constant dense<0.000000e+00> : vector<16x8xf32>
    %85 = tpu.matmul %84, %74, %cst_71 {dimension_numbers = #tpu.dot_dimension_numbers<[1], [0], [0], [1], [0, 0, 1, 1], [], []>} : vector<16x12xf32>, vector<12x8xf32>, vector<16x8xf32> -> vector<16x8xf32>
    %86 = vector.extract_strided_slice %85 {offsets = [0, 0], sizes = [8, 8], strides = [1, 1]} : vector<16x8xf32> to vector<8x8xf32>
    %c0_72 = arith.constant 0 : index
    %c0_73 = arith.constant 0 : index
    %87 = vector.load %arg15[%c0_72, %c0_73] : memref<16x32xf32, #tpu.memory_space<vmem>>, vector<8x8xf32>
    tpu.vector_store %arg15[%c0_72, %c0_73], %86 {strides = array<i32>} : memref<16x32xf32, #tpu.memory_space<vmem>>, vector<8x8xf32>,
    %88 = vector.extract_strided_slice %85 {offsets = [8, 0], sizes = [8, 8], strides = [1, 1]} : vector<16x8xf32> to vector<8x8xf32>
    %c0_74 = arith.constant 0 : index
    %c8_75 = arith.constant 8 : index
    %89 = vector.load %arg15[%c0_74, %c8_75] : memref<16x32xf32, #tpu.memory_space<vmem>>, vector<8x8xf32>
    tpu.vector_store %arg15[%c0_74, %c8_75], %88 {strides = array<i32>} : memref<16x32xf32, #tpu.memory_space<vmem>>, vector<8x8xf32>,
    %90 = vector.extract_strided_slice %20 {offsets = [0, 16], sizes = [8, 8], strides = [1, 1]} : vector<16x32xf32> to vector<8x8xf32>
    %91 = vector.extract_strided_slice %20 {offsets = [0, 24], sizes = [8, 8], strides = [1, 1]} : vector<16x32xf32> to vector<8x8xf32>
    %92 = tpu.concatenate %90, %91 in 0 : vector<8x8xf32>, vector<8x8xf32> -> vector<16x8xf32>
    %c0_76 = arith.constant 0 : index
    %c8_77 = arith.constant 8 : index
    %c0_78 = arith.constant 0 : index
    %93 = vector.load %arg13[%c0_76, %c8_77, %c0_78] : memref<2x16x12xf32, #tpu.memory_space<vmem>>, vector<1x8x12xf32>
    %94 = vector.shape_cast %93 : vector<1x8x12xf32> to vector<8x12xf32>
    %c0_79 = arith.constant 0 : index
    %c0_80 = arith.constant 0 : index
    %c8_81 = arith.constant 8 : index
    %95 = vector.load %arg14[%c0_79, %c0_80, %c8_81] : memref<2x12x16xf32, #tpu.memory_space<vmem>>, vector<1x12x8xf32>
    %96 = vector.shape_cast %95 : vector<1x12x8xf32> to vector<12x8xf32>
    %cst_82 = arith.constant dense<0.000000e+00> : vector<16x12xf32>
    %97 = tpu.matmul %92, %94, %cst_82 {dimension_numbers = #tpu.dot_dimension_numbers<[1], [0], [0], [1], [0, 0, 1, 1], [], []>} : vector<16x8xf32>, vector<8x12xf32>, vector<16x12xf32> -> vector<16x12xf32>
    %cst_83 = arith.constant dense<0xFF800000> : vector<16xf32>
    %98 = vector.multi_reduction <maximumf>, %97, %cst_83 [1] : vector<16x12xf32> to vector<16xf32>
    %99 = vector.shape_cast %98 : vector<16xf32> to vector<16x1xf32>
    %100 = vector.broadcast %99 : vector<16x1xf32> to vector<16x12xf32>
    %101 = arith.subf %97, %100 : vector<16x12xf32>
    %102 = math.exp %101 : vector<16x12xf32>
    %cst_84 = arith.constant dense<0.000000e+00> : vector<16xf32>
    %103 = vector.multi_reduction <add>, %102, %cst_84 [1] : vector<16x12xf32> to vector<16xf32>
    %104 = vector.shape_cast %103 : vector<16xf32> to vector<16x1xf32>
    %105 = vector.broadcast %104 : vector<16x1xf32> to vector<16x12xf32>
    %106 = arith.divf %102, %105 : vector<16x12xf32>
    %cst_85 = arith.constant dense<0.000000e+00> : vector<16x8xf32>
    %107 = tpu.matmul %106, %96, %cst_85 {dimension_numbers = #tpu.dot_dimension_numbers<[1], [0], [0], [1], [0, 0, 1, 1], [], []>} : vector<16x12xf32>, vector<12x8xf32>, vector<16x8xf32> -> vector<16x8xf32>
    %108 = vector.extract_strided_slice %107 {offsets = [0, 0], sizes = [8, 8], strides = [1, 1]} : vector<16x8xf32> to vector<8x8xf32>
    %c0_86 = arith.constant 0 : index
    %c16 = arith.constant 16 : index
    %109 = vector.load %arg15[%c0_86, %c16] : memref<16x32xf32, #tpu.memory_space<vmem>>, vector<8x8xf32>
    tpu.vector_store %arg15[%c0_86, %c16], %108 {strides = array<i32>} : memref<16x32xf32, #tpu.memory_space<vmem>>, vector<8x8xf32>,
    %110 = vector.extract_strided_slice %107 {offsets = [8, 0], sizes = [8, 8], strides = [1, 1]} : vector<16x8xf32> to vector<8x8xf32>
    %c0_87 = arith.constant 0 : index
    %c24 = arith.constant 24 : index
    %111 = vector.load %arg15[%c0_87, %c24] : memref<16x32xf32, #tpu.memory_space<vmem>>, vector<8x8xf32>
    tpu.vector_store %arg15[%c0_87, %c24], %110 {strides = array<i32>} : memref<16x32xf32, #tpu.memory_space<vmem>>, vector<8x8xf32>,
    %112 = vector.extract_strided_slice %20 {offsets = [8, 0], sizes = [8, 8], strides = [1, 1]} : vector<16x32xf32> to vector<8x8xf32>
    %113 = vector.extract_strided_slice %20 {offsets = [8, 8], sizes = [8, 8], strides = [1, 1]} : vector<16x32xf32> to vector<8x8xf32>
    %114 = tpu.concatenate %112, %113 in 0 : vector<8x8xf32>, vector<8x8xf32> -> vector<16x8xf32>
    %c1_88 = arith.constant 1 : index
    %c0_89 = arith.constant 0 : index
    %c0_90 = arith.constant 0 : index
    %115 = vector.load %arg13[%c1_88, %c0_89, %c0_90] : memref<2x16x12xf32, #tpu.memory_space<vmem>>, vector<1x8x12xf32>
    %116 = vector.shape_cast %115 : vector<1x8x12xf32> to vector<8x12xf32>
    %c1_91 = arith.constant 1 : index
    %c0_92 = arith.constant 0 : index
    %c0_93 = arith.constant 0 : index
    %117 = vector.load %arg14[%c1_91, %c0_92, %c0_93] : memref<2x12x16xf32, #tpu.memory_space<vmem>>, vector<1x12x8xf32>
    %118 = vector.shape_cast %117 : vector<1x12x8xf32> to vector<12x8xf32>
    %cst_94 = arith.constant dense<0.000000e+00> : vector<16x12xf32>
    %119 = tpu.matmul %114, %116, %cst_94 {dimension_numbers = #tpu.dot_dimension_numbers<[1], [0], [0], [1], [0, 0, 1, 1], [], []>} : vector<16x8xf32>, vector<8x12xf32>, vector<16x12xf32> -> vector<16x12xf32>
    %cst_95 = arith.constant dense<0xFF800000> : vector<16xf32>
    %120 = vector.multi_reduction <maximumf>, %119, %cst_95 [1] : vector<16x12xf32> to vector<16xf32>
    %121 = vector.shape_cast %120 : vector<16xf32> to vector<16x1xf32>
    %122 = vector.broadcast %121 : vector<16x1xf32> to vector<16x12xf32>
    %123 = arith.subf %119, %122 : vector<16x12xf32>
    %124 = math.exp %123 : vector<16x12xf32>
    %cst_96 = arith.constant dense<0.000000e+00> : vector<16xf32>
    %125 = vector.multi_reduction <add>, %124, %cst_96 [1] : vector<16x12xf32> to vector<16xf32>
    %126 = vector.shape_cast %125 : vector<16xf32> to vector<16x1xf32>
    %127 = vector.broadcast %126 : vector<16x1xf32> to vector<16x12xf32>
    %128 = arith.divf %124, %127 : vector<16x12xf32>
    %cst_97 = arith.constant dense<0.000000e+00> : vector<16x8xf32>
    %129 = tpu.matmul %128, %118, %cst_97 {dimension_numbers = #tpu.dot_dimension_numbers<[1], [0], [0], [1], [0, 0, 1, 1], [], []>} : vector<16x12xf32>, vector<12x8xf32>, vector<16x8xf32> -> vector<16x8xf32>
    %130 = vector.extract_strided_slice %129 {offsets = [0, 0], sizes = [8, 8], strides = [1, 1]} : vector<16x8xf32> to vector<8x8xf32>
    %c8_98 = arith.constant 8 : index
    %c0_99 = arith.constant 0 : index
    %131 = vector.load %arg15[%c8_98, %c0_99] : memref<16x32xf32, #tpu.memory_space<vmem>>, vector<8x8xf32>
    tpu.vector_store %arg15[%c8_98, %c0_99], %130 {strides = array<i32>} : memref<16x32xf32, #tpu.memory_space<vmem>>, vector<8x8xf32>,
    %132 = vector.extract_strided_slice %129 {offsets = [8, 0], sizes = [8, 8], strides = [1, 1]} : vector<16x8xf32> to vector<8x8xf32>
    %c8_100 = arith.constant 8 : index
    %c8_101 = arith.constant 8 : index
    %133 = vector.load %arg15[%c8_100, %c8_101] : memref<16x32xf32, #tpu.memory_space<vmem>>, vector<8x8xf32>
    tpu.vector_store %arg15[%c8_100, %c8_101], %132 {strides = array<i32>} : memref<16x32xf32, #tpu.memory_space<vmem>>, vector<8x8xf32>,
    %134 = vector.extract_strided_slice %20 {offsets = [8, 16], sizes = [8, 8], strides = [1, 1]} : vector<16x32xf32> to vector<8x8xf32>
    %135 = vector.extract_strided_slice %20 {offsets = [8, 24], sizes = [8, 8], strides = [1, 1]} : vector<16x32xf32> to vector<8x8xf32>
    %136 = tpu.concatenate %134, %135 in 0 : vector<8x8xf32>, vector<8x8xf32> -> vector<16x8xf32>
    %c1_102 = arith.constant 1 : index
    %c8_103 = arith.constant 8 : index
    %c0_104 = arith.constant 0 : index
    %137 = vector.load %arg13[%c1_102, %c8_103, %c0_104] : memref<2x16x12xf32, #tpu.memory_space<vmem>>, vector<1x8x12xf32>
    %138 = vector.shape_cast %137 : vector<1x8x12xf32> to vector<8x12xf32>
    %c1_105 = arith.constant 1 : index
    %c0_106 = arith.constant 0 : index
    %c8_107 = arith.constant 8 : index
    %139 = vector.load %arg14[%c1_105, %c0_106, %c8_107] : memref<2x12x16xf32, #tpu.memory_space<vmem>>, vector<1x12x8xf32>
    %140 = vector.shape_cast %139 : vector<1x12x8xf32> to vector<12x8xf32>
    %cst_108 = arith.constant dense<0.000000e+00> : vector<16x12xf32>
    %141 = tpu.matmul %136, %138, %cst_108 {dimension_numbers = #tpu.dot_dimension_numbers<[1], [0], [0], [1], [0, 0, 1, 1], [], []>} : vector<16x8xf32>, vector<8x12xf32>, vector<16x12xf32> -> vector<16x12xf32>
    %cst_109 = arith.constant dense<0xFF800000> : vector<16xf32>
    %142 = vector.multi_reduction <maximumf>, %141, %cst_109 [1] : vector<16x12xf32> to vector<16xf32>
    %143 = vector.shape_cast %142 : vector<16xf32> to vector<16x1xf32>
    %144 = vector.broadcast %143 : vector<16x1xf32> to vector<16x12xf32>
    %145 = arith.subf %141, %144 : vector<16x12xf32>
    %146 = math.exp %145 : vector<16x12xf32>
    %cst_110 = arith.constant dense<0.000000e+00> : vector<16xf32>
    %147 = vector.multi_reduction <add>, %146, %cst_110 [1] : vector<16x12xf32> to vector<16xf32>
    %148 = vector.shape_cast %147 : vector<16xf32> to vector<16x1xf32>
    %149 = vector.broadcast %148 : vector<16x1xf32> to vector<16x12xf32>
    %150 = arith.divf %146, %149 : vector<16x12xf32>
    %cst_111 = arith.constant dense<0.000000e+00> : vector<16x8xf32>
    %151 = tpu.matmul %150, %140, %cst_111 {dimension_numbers = #tpu.dot_dimension_numbers<[1], [0], [0], [1], [0, 0, 1, 1], [], []>} : vector<16x12xf32>, vector<12x8xf32>, vector<16x8xf32> -> vector<16x8xf32>
    %152 = vector.extract_strided_slice %151 {offsets = [0, 0], sizes = [8, 8], strides = [1, 1]} : vector<16x8xf32> to vector<8x8xf32>
    %c8_112 = arith.constant 8 : index
    %c16_113 = arith.constant 16 : index
    %153 = vector.load %arg15[%c8_112, %c16_113] : memref<16x32xf32, #tpu.memory_space<vmem>>, vector<8x8xf32>
    tpu.vector_store %arg15[%c8_112, %c16_113], %152 {strides = array<i32>} : memref<16x32xf32, #tpu.memory_space<vmem>>, vector<8x8xf32>,
    %154 = vector.extract_strided_slice %151 {offsets = [8, 0], sizes = [8, 8], strides = [1, 1]} : vector<16x8xf32> to vector<8x8xf32>
    %c8_114 = arith.constant 8 : index
    %c24_115 = arith.constant 24 : index
    %155 = vector.load %arg15[%c8_114, %c24_115] : memref<16x32xf32, #tpu.memory_space<vmem>>, vector<8x8xf32>
    tpu.vector_store %arg15[%c8_114, %c24_115], %154 {strides = array<i32>} : memref<16x32xf32, #tpu.memory_space<vmem>>, vector<8x8xf32>,
    %c0_116 = arith.constant 0 : index
    %c0_117 = arith.constant 0 : index
    %156 = vector.load %arg15[%c0_116, %c0_117] : memref<16x32xf32, #tpu.memory_space<vmem>>, vector<16x32xf32>
    %c0_118 = arith.constant 0 : index
    %c0_119 = arith.constant 0 : index
    %157 = vector.load %arg5[%c0_118, %c0_119] : memref<32x32xf32, #tpu.memory_space<vmem>>, vector<32x32xf32>
    %cst_120 = arith.constant dense<0.000000e+00> : vector<16x32xf32>
    %158 = tpu.matmul %156, %157, %cst_120 {dimension_numbers = #tpu.dot_dimension_numbers<[1], [0], [0], [1], [0, 0, 1, 1], [], []>} : vector<16x32xf32>, vector<32x32xf32>, vector<16x32xf32> -> vector<16x32xf32>
    %c0_121 = arith.constant 0 : index
    %c0_122 = arith.constant 0 : index
    %159 = vector.load %arg12[%c0_121, %c0_122] : memref<16x32xf32, #tpu.memory_space<vmem>>, vector<16x32xf32>
    tpu.vector_store %arg12[%c0_121, %c0_122], %158 {strides = array<i32>} : memref<16x32xf32, #tpu.memory_space<vmem>>, vector<16x32xf32>,
    return
  }
}

</mosaic_0001>

<bundles_post_ra>
// kernel: tpu_custom_call.1
= control target key start
LH: loop header
LB: loop body
LE: loop exit
PB: predicated region body
PF: predicated region fallthrough
CT: control target
= control target key end

     0   :  { %vm52_vm0 = vcmask 261120   ;;  %s2213_s0 = inlined_call_operand.vmem [shape: f32[16,32], index: 0, kind: input, shape index: {}]   ;;  %s2214_s1 = inlined_call_operand.vmem [shape: f32[32,16], index: 1, kind: input, shape index: {}]   ;;  %s2215_s2 = inlined_call_operand.vmem [shape: f32[32,32], index: 2, kind: input, shape index: {}]   ;;  %s2216_s3 = inlined_call_operand.vmem [shape: f32[16,32], index: 3, kind: input, shape index: {}]   ;;  %s2217_s4 = inlined_call_operand.vmem [shape: f32[32,16], index: 4, kind: input, shape index: {}]   ;;  %s2218_s5 = inlined_call_operand.vmem [shape: f32[32,32], index: 5, kind: input, shape index: {}]   ;;  %s2219_s6 = inlined_call_operand.vmem [shape: f32[2,16,4], index: 6, kind: input, shape index: {}]   ;;  %s2220_s7 = inlined_call_operand.vmem [shape: f32[2,4,16], index: 7, kind: input, shape index: {}]   ;;  %s2221_s8 = inlined_call_operand.vmem [shape: f32[32,4], index: 8, kind: input, shape index: {}]   ;;  %s2222_s9 = inlined_call_operand.vmem [shape: f32[4,32], index: 9, kind: input, shape index: {}]   ;;  %s2223_s10 = inlined_call_operand.vmem [shape: f32[2,16], index: 10, kind: input, shape index: {}]   ;;  %s2224_s11 = inlined_call_operand.vmem [shape: f32[16,2], index: 11, kind: input, shape index: {}]   ;;  %s2225_s12 = inlined_call_operand.hbm [shape: f32[16,32], index: 12, kind: output, shape index: {}]  }
   0x1   :  { %v51_v0 = vld [vmem:[%s2215_s2 + $0x18] sm:$0xff]  ;;  %v50_v1 = vld [vmem:[%s2215_s2 + $0x10] sm:$0xff]  ;;  %v42_v2 = vld [vmem:[%s2213_s0] sm:$0xff] }
   0x2   :  { %1725 = vmatprep.subr.mxu0 %v51_v0  ;;  %v49_v3 = vld [vmem:[%s2215_s2 + $0x8] sm:$0xff]  ;;  %1733 = vmatprep.mubr.msk.f32.mxu0 %vm52_vm0, %v42_v2  ;;  %v48_v4 = vld [vmem:[%s2215_s2] sm:$0xff]  ;;  %v137_v5 = vld [vmem:[%s2217_s4 + $0x18] sm:$0xff] }
   0x3   :  { %1726 = vmatpush3.msra.mxu0 %v51_v0  ;;  %1744 = vmatprep.mubr.msk.f32.mxu1 %vm52_vm0, %v42_v2  ;;  %v136_v6 = vld [vmem:[%s2217_s4 + $0x10] sm:$0xff] }
   0x4   :  { %1727 = vmatprep.subr.mxu0 %v50_v1  ;;  %1736 = vmatprep.subr.mxu1 %v137_v5 }
   0x5   :  { %1728 = vmatpush3.msra.mxu0 %v50_v1 }
   0x6   :  { %1729 = vmatprep.subr.mxu0 %v49_v3 }
   0x7   :  { %17 = vsyncpa [#allocation6], 0  ;;  %1730 = vmatpush3.msra.mxu0 %v49_v3  ;;  %v43_v7 = vld [vmem:[%s2213_s0 + $0x8] sm:$0xff]  ;;  %v47_v8 = vld [vmem:[%s2214_s1 + $0x18] sm:$0xff]  ;;  %1737 = vmatpush3.msra.mxu1 %v137_v5  ;;  %v1914_v20 = vmov 0.0   ;;  %vm483_vm1 = vcmask 130048  }
   0x8   :  { %1731 = vmatprep.subr.mxu0 %v48_v4  ;;  %v213_v9 = vld [vmem:[%s2216_s3] sm:$0xff]  ;;  %1738 = vmatprep.subr.mxu1 %v136_v6  ;;  %v46_v10 = vld [vmem:[%s2214_s1 + $0x10] sm:$0xff]  ;;  %v135_v11 = vld [vmem:[%s2217_s4 + $0x8] sm:$0xff]  ;;  %vm1915_vm2 = vmmov 0   ;;  %vm668_vm3 = vcmask 125952   ;;  %vm399_vm4 = vcmask 1043456  }
   0x9   :  { %1732 = vmatpush3.msra.mxu0 %v48_v4  ;;  %1739 = vmatpush3.msra.mxu1 %v136_v6  ;;  %v45_v12 = vld [vmem:[%s2214_s1 + $0x8] sm:$0xff]  ;;  %v134_v13 = vld [vmem:[%s2217_s4] sm:$0xff]  ;;  %v301_v15 = vld [vmem:[%s2221_s8 + $0x18] sm:$0xff]  ;;  %s1916_s25 = smov 8   ;;  %vm392_vm5 = vcmask 31744   ;;  %vm562_vm6 = vcmask 15360  }
   0xa   :  { %1734 = vmatmul.mubr.msk.f32.vlgmr.msra.gmra.mxu0 %vm52_vm0, %v43_v7  ;;  %1747 = vmatprep.subr.mxu0 %v47_v8  ;;  %v44_v14 = vld [vmem:[%s2214_s1] sm:$0xff]  ;;  %v214_v16 = vld [vmem:[%s2216_s3 + $0x8] sm:$0xff]  ;;  %v300_v17 = vld [vmem:[%s2221_s8 + $0x10] sm:$0xff]  ;;  %vm569_vm7 = vcmask 1041408   ;;  %vm650_vm8 = vcmask 64512   ;;  %s1917_s15 = smov 120  }
   0xb   :  { %1748 = vmatpush3.msra.mxu0 %v47_v8  ;;  %1755 = vmatprep.mubr.msk.f32.mxu0 %vm52_vm0, %v213_v9  ;;  %v299_v18 = vld [vmem:[%s2221_s8 + $0x8] sm:$0xff]  ;;  %v298_v19 = vld [vmem:[%s2221_s8] sm:$0xff]  ;;  %v1633_v55 = vld [vmem:[%s2219_s6 + $0x10] sm:$0xff]  ;;  %vm664_vm9 = vcmask 97344   ;;  %vm784_vm10 = vcmask 97280   ;;  %s1920_s4 = smov 16  }
   0xc   :  { %1749 = vmatprep.subr.mxu0 %v46_v10  ;;  %1740 = vmatprep.subr.mxu1 %v135_v11  ;;  %v480_v31 = vld [vmem:[%s2223_s10] sm:$0x3]  ;;  %v561_v51 = vld [vmem:[%s2224_s11 + $0x8] sm:$0xff]  ;;  %v1634_v56 = vld [vmem:[%s2219_s6 + $0x18] sm:$0xff]  ;;  %vm896_vm11 = vcmask 130112   ;;  %vm1100_vm12 = vcmask 195712  }
   0xd   :  { %1750 = vmatpush3.msra.mxu0 %v46_v10  ;;  %1741 = vmatpush3.msra.mxu1 %v135_v11  ;;  %v667_v32 = vld [vmem:[%s2220_s7] sm:$0xf]  ;;  %v655_v54 = vld [vmem:[%s2219_s6 + $0x8] sm:$0xff]  ;;  %vm1106_vm13 = vcmask 261312  }
   0xe   :  { %1751 = vmatprep.subr.mxu0 %v45_v12  ;;  %1742 = vmatprep.subr.mxu1 %v134_v13  ;;  %v391_v33 = vld [vmem:[%s2222_s9] sm:$0xf]  ;;  %669 = vst.msk [vmem:[#allocation3 + $0x8] sm:$0xf] %vm668_vm3, %v667_v32 }
   0xf   :  { %1752 = vmatpush3.msra.mxu0 %v45_v12  ;;  %1743 = vmatpush3.msra.mxu1 %v134_v13  ;;  %v654_v34 = vld [vmem:[%s2219_s6] sm:$0xff]  ;;  %s1918_s6 = smov 112  }
  0x10   :  { %1753 = vmatprep.subr.mxu0 %v44_v14  ;;  %1745 = vmatmul.mubr.msk.f32.vlgmr.msra.gmra.mxu1 %vm52_vm0, %v43_v7  ;;  %v560_v49 = vld [vmem:[%s2224_s11] sm:$0xff] }
  0x11   :  { %1754 = vmatpush3.msra.mxu0 %v44_v14  ;;  %1758 = vmatprep.subr.mxu1 %v301_v15 }
  0x12   :  { %1756 = vmatmul.mubr.msk.f32.vlgmr.msra.gmra.mxu0 %vm52_vm0, %v214_v16  ;;  %1759 = vmatpush3.msra.mxu1 %v301_v15 }
  0x13   :  { %1760 = vmatprep.subr.mxu1 %v300_v17  ;;  %1769 = vmatprep.subr.msk.mxu0 %vm399_vm4, %v391_v33 }
  0x14   :  { %1761 = vmatpush3.msra.mxu1 %v300_v17  ;;  %1770 = vmatpush3.msk.msra.mxu0 %vm399_vm4, %v391_v33 }
  0x15   :  { %1762 = vmatprep.subr.mxu1 %v299_v18  ;;  %658 = vrot.lane.b32.xlu1 %v654_v34, %s1916_s25  ;;  %v704_v52 = vld [vmem:[#allocation3 + $0x8] sm:$0xf] }
  0x16   :  { %1763 = vmatpush3.msra.mxu1 %v299_v18 }
  0x17   :  { %1764 = vmatprep.subr.mxu1 %v298_v19 }
  0x18   :  { %1765 = vmatpush3.msra.mxu1 %v298_v19 }
  0x19   :  { %1774 = vmatprep.subr.mxu1 %v1914_v20  ;;  %660 = vrot.lane.b32.xlu1 %v655_v54, %s1916_s25 }
  0x1d   :  { %688 = vrot.lane.b32.xlu1 %v1633_v55, %s1916_s25 }
  0x21   :  { %690 = vrot.lane.b32.xlu1 %v1634_v56, %s1916_s25 }
  0x87   :  { %v659_v1 = vpop.permute.xlu1 %658 }
  0x8b   :  { %v661_v2 = vpop.permute.xlu1 %660 }
  0x8f   :  { %v689_v7 = vpop.permute.xlu1 %688 }
  0x93   :  { %v691_v9 = vpop.permute.xlu1 %690 }
  0xca   :  { %v2054_v21 = vpop.f32.mrf.mxu0 }
  0xcb   :  { %v297_v24 = vmul.f32 %v2054_v21, %v2054_v21 }
  0xcc   :  { %v2056_v22 = vpop.f32.mrf.mxu0 }
  0xcd   :  { %v296_v23 = vmul.f32 %v2056_v22, %v2056_v22 }
  0xcf   :  { %1766 = vmatprep.mubr.msk.f32.mxu1 %vm52_vm0, %v296_v23 }
  0xd0   :  { %1767 = vmatmul.mubr.msk.f32.vlgmr.msra.gmra.mxu1 %vm52_vm0, %v297_v24  ;;  %v1746_v25 = vpop.f32.mrf.mxu1 }
  0xd1   :  { %1778 = vmatprep.mubr.msk.f32.mxu1 %vm1915_vm2, %v1914_v20  ;;  %682 = vst.msk [vmem:[#allocation3 + $0x10] sm:$0xff] %vm483_vm1, %v1746_v25 }
  0xd2   :  { %v2064_v26 = vpop.f32.mrf.mxu0  ;;  %v204_v27 = vpop.f32.mrf.mxu1 }
  0xd3   :  { %v482_v28 = vmul.f32 %v2064_v26, %v2064_v26  ;;  %653 = vst.msk [vmem:[#allocation3] sm:$0xff] %vm483_vm1, %v204_v27 }
  0xd4   :  { %v2068_v29 = vpop.f32.mrf.mxu0 }
  0xd5   :  { %v481_v30 = vmul.f32 %v2068_v29, %v2068_v29  ;;  %1775 = vmatpush3.msra.mxu1 %v482_v28 }
  0xd6   :  { %1776 = vmatprep.subr.mxu1 %v1914_v20 }
  0xd7   :  { %1777 = vmatpush3.msra.mxu1 %v481_v30 }
  0xd8   :  { %1779 = vmatmul.mubr.msk.f32.vlgmr.msra.gmra.mxu1 %vm483_vm1, %v480_v31 }
  0xda   :  { %v2096_v53 = vld [vmem:[#allocation3] sm:$0xff] }
 0x190   :  { %v1768_v35 = vpop.f32.mrf.mxu1 }
 0x191   :  { %v384_v36 = vmul.f32 0.125, %v1768_v35  ;;  %v900_v35 = vld [vmem:[#allocation3 + $0x8] sm:$0xf] }
 0x192   :  { %v374_v37 = vpop.f32.mrf.mxu1 }
 0x193   :  { %v386_v38 = vadd.f32 1e-06, %v384_v36  ;;  %v383_v39 = vmul.f32 0.125, %v374_v37 }
 0x195   :  { %v385_v40 = vadd.f32 1e-06, %v383_v39  ;;  %1854 = vrsqrt.f32 %v386_v38 }
 0x197   :  { %1856 = vrsqrt.f32 %v385_v40 }
 0x198   :  { %v553_v41 = vpop.f32.mrf.mxu1 }
 0x199   :  { %v557_v42 = vmul.f32 0.125, %v553_v41 }
 0x19a   :  { %v1780_v43 = vpop.f32.mrf.mxu1 }
 0x19b   :  { %v558_v44 = vadd.f32 1e-06, %v557_v42  ;;  %v1635_v42 = vld [vmem:[%s2220_s7 + $0x4] sm:$0xf]  ;;  %s1919_s7 = smov 24  }
 0x19c   :  { %698 = vst.msk [vmem:[#allocation3 + $0x18] sm:$0xf] %vm668_vm3, %v1635_v42 }
 0x19d   :  { %1858 = vrsqrt.f32 %v558_v44 }
 0x1a2   :  { %v1855_v45 = vpop.eup %1854 }
 0x1a3   :  { %v390_v48 = vmul.f32 0.35355338, %v1855_v45 }
 0x1a4   :  { %v1857_v46 = vpop.eup %1856 }
 0x1a5   :  { %v389_v47 = vmul.f32 0.35355338, %v1857_v46 }
 0x1a7   :  { %1771 = vmatprep.mubr.msk.f32.mxu0 %vm392_vm5, %v389_v47 }
 0x1a8   :  { %1772 = vmatmul.mubr.msk.f32.vlgmr.msra.gmra.mxu0 %vm392_vm5, %v390_v48 }
 0x1a9   :  { %1783 = vmatprep.mubr.msk.f32.mxu0 %vm562_vm6, %v560_v49 }
 0x1aa   :  { %v1859_v50 = vpop.eup %1858 }
 0x1ab   :  { %1781 = vmatprep.subr.msk.mxu0 %vm569_vm7, %v1859_v50 }
 0x1ac   :  { %1782 = vmatpush3.msk.msra.mxu0 %vm569_vm7, %v1859_v50 }
 0x1ad   :  { %1784 = vmatmul.mubr.msk.f32.vlgmr.msra.gmra.mxu0 %vm562_vm6, %v561_v51  ;;  %1791 = vmatprep.subr.msk.mxu0 %vm399_vm4, %v704_v52 }
 0x1ae   :  { %1792 = vmatpush3.msk.msra.mxu0 %vm399_vm4, %v704_v52 }
 0x1af   :  { %1793 = vmatprep.subr.mxu0 %v2096_v53 }
 0x1b0   :  { %1794 = vmatpush3.msra.mxu0 %v2096_v53 }
 0x268   :  { %v1773_v57 = vpop.f32.mrf.mxu0 }
 0x269   :  { %v479_v62 = vmul.f32 %v1773_v57, %v2054_v21 }
 0x26a   :  { %v469_v58 = vpop.f32.mrf.mxu0 }
 0x26b   :  { %v478_v59 = vmul.f32 %v469_v58, %v2056_v22 }
 0x26d   :  { %v1785_v60 = vpop.f32.mrf.mxu0  ;;  %700 = vrot.lane.b32.xlu0 %v478_v59, %s1917_s15  ;;  %1788 = vmatprep.mubr.msk.f32.mxu1 %vm650_vm8, %v478_v59 }
 0x26e   :  { %v649_v61 = vmul.f32 %v1785_v60, %v2064_v26 }
 0x26f   :  { %v639_v63 = vpop.f32.mrf.mxu0 }
 0x270   :  { %652 = vst.msk [vmem:[#allocation2 + $0x8] sm:$0xff] %vm650_vm8, %v649_v61  ;;  %v648_v0 = vmul.f32 %v639_v63, %v2068_v29 }
 0x271   :  { %1109 = vrot.lane.b32.xlu0 %v479_v62, %s1917_s15  ;;  %666 = vst.msk [vmem:[#allocation2 + $0x8] sm:$0xff] %vm664_vm9, %v661_v2 }
 0x272   :  { %651 = vst.msk [vmem:[#allocation2] sm:$0xff] %vm650_vm8, %v648_v0 }
 0x273   :  { %665 = vst.msk [vmem:[#allocation2] sm:$0xff] %vm664_vm9, %v659_v1 }
 0x275   :  { %672 = vrot.lane.b32.xlu0 %v648_v0, %s1917_s15 }
 0x278   :  { %v898_v4 = vld [vmem:[#allocation2 + $0x8] sm:$0xff] }
 0x279   :  { %674 = vrot.lane.b32.xlu0 %v649_v61, %s1917_s15 }
 0x27a   :  { %v702_v3 = vld [vmem:[#allocation2] sm:$0xff] }
 0x27b   :  { %1786 = vmatprep.subr.mxu1 %v702_v3 }
 0x27c   :  { %1787 = vmatpush3.msra.mxu1 %v702_v3 }
 0x27d   :  { %901 = vrot.lane.b32.xlu0 %v478_v59, %s1918_s6  ;;  %1798 = vmatprep.subr.mxu1 %v898_v4 }
 0x281   :  { %1308 = vrot.lane.b32.xlu0 %v479_v62, %s1918_s6 }
 0x2df   :  { %v701_v5 = vpop.permute.xlu0 %700 }
 0x2e0   :  { %903 = vrot.lane.b32.xlu1 %v701_v5, %s1918_s6  ;;  %1789 = vmatmul.mubr.msk.f32.vlgmr.msra.gmra.mxu1 %vm650_vm8, %v701_v5 }
 0x2e1   :  { %1799 = vmatpush3.msra.mxu1 %v898_v4 }
 0x2e3   :  { %v1110_v6 = vpop.permute.xlu0 %1109 }
 0x2e4   :  { %1310 = vrot.lane.b32.xlu1 %v1110_v6, %s1918_s6 }
 0x2e7   :  { %v673_v8 = vpop.permute.xlu0 %672 }
 0x2e8   :  { %679 = vst.msk [vmem:[#allocation2 + $0x10] sm:$0xff] %vm650_vm8, %v673_v8 }
 0x2e9   :  { %694 = vst.msk [vmem:[#allocation2 + $0x10] sm:$0xff] %vm664_vm9, %v689_v7 }
 0x2eb   :  { %v675_v10 = vpop.permute.xlu0 %674 }
 0x2ec   :  { %680 = vst.msk [vmem:[#allocation2 + $0x18] sm:$0xff] %vm650_vm8, %v675_v10 }
 0x2ed   :  { %695 = vst.msk [vmem:[#allocation2 + $0x18] sm:$0xff] %vm664_vm9, %v691_v9  ;;  %v1307_v9 = vld [vmem:[#allocation3 + $0x18] sm:$0xf] }
 0x2ef   :  { %v902_v11 = vpop.permute.xlu0 %901 }
 0x2f0   :  { %1800 = vmatprep.mubr.msk.f32.mxu1 %vm650_vm8, %v902_v11  ;;  %v1111_v12 = vld [vmem:[#allocation2 + $0x10] sm:$0xff] }
 0x2f1   :  { %1810 = vmatprep.subr.mxu1 %v1111_v12 }
 0x2f3   :  { %v1309_v15 = vpop.permute.xlu0 %1308 }
 0x2f4   :  { %v1305_v14 = vld [vmem:[#allocation2 + $0x18] sm:$0xff] }
 0x352   :  { %v904_v13 = vpop.permute.xlu1 %903 }
 0x353   :  { %1801 = vmatmul.mubr.msk.f32.vlgmr.msra.gmra.mxu1 %vm650_vm8, %v904_v13 }
 0x354   :  { %1811 = vmatpush3.msra.mxu1 %v1111_v12  ;;  %1812 = vmatprep.mubr.msk.f32.mxu1 %vm650_vm8, %v479_v62 }
 0x355   :  { %1822 = vmatprep.subr.mxu1 %v1305_v14 }
 0x356   :  { %v1311_v16 = vpop.permute.xlu1 %1310 }
 0x357   :  { %1813 = vmatmul.mubr.msk.f32.vlgmr.msra.gmra.mxu1 %vm650_vm8, %v1110_v6 }
 0x358   :  { %1823 = vmatpush3.msra.mxu1 %v1305_v14  ;;  %1824 = vmatprep.mubr.msk.f32.mxu1 %vm650_vm8, %v1309_v15 }
 0x35b   :  { %1825 = vmatmul.mubr.msk.f32.vlgmr.msra.gmra.mxu1 %vm650_vm8, %v1311_v16 }
 0x3a0   :  { %v1790_v17 = vpop.f32.mrf.mxu1 }
 0x3a1   :  { %v788_v18 = vsel %vm784_vm10, %v1790_v17, -inf }
 0x3a2   :  { %789 = vmax.xlane.f32.xlu1 %v788_v18  ;;  %v775_v19 = vpop.f32.mrf.mxu1 }
 0x3a3   :  { %v785_v20 = vsel %vm784_vm10, %v775_v19, -inf }
 0x3a4   :  { %786 = vmax.xlane.f32.xlu0 %v785_v20 }
 0x413   :  { %v1802_v21 = vpop.f32.mrf.mxu1 }
 0x414   :  { %v987_v27 = vsel %vm784_vm10, %v1802_v21, -inf }
 0x415   :  { %v975_v22 = vpop.f32.mrf.mxu1 }
 0x416   :  { %v984_v23 = vsel %vm784_vm10, %v975_v22, -inf }
 0x417   :  { %v1814_v24 = vpop.f32.mrf.mxu1  ;;  %985 = vmax.xlane.f32.xlu0 %v984_v23 }
 0x418   :  { %v1196_v31 = vsel %vm784_vm10, %v1814_v24, -inf }
 0x419   :  { %v1184_v25 = vpop.f32.mrf.mxu1 }
 0x41a   :  { %v1193_v26 = vsel %vm784_vm10, %v1184_v25, -inf }
 0x41b   :  { %v1826_v28 = vpop.f32.mrf.mxu1  ;;  %1194 = vmax.xlane.f32.xlu1 %v1193_v26  ;;  %988 = vmax.xlane.f32.xlu0 %v987_v27 }
 0x41c   :  { %v1394_v32 = vsel %vm784_vm10, %v1826_v28, -inf }
 0x41d   :  { %v2141_v29 = vpop.f32.mrf.mxu1 }
 0x41e   :  { %v1391_v30 = vsel %vm784_vm10, %v2141_v29, -inf }
 0x41f   :  { %1392 = vmax.xlane.f32.xlu1 %v1391_v30  ;;  %1197 = vmax.xlane.f32.xlu0 %v1196_v31 }
 0x423   :  { %1395 = vmax.xlane.f32.xlu0 %v1394_v32 }
 0x42b   :  { %v790_v33 = vpop.xlane.xlu1 %789 }
 0x42c   :  { %v792_v34 = vsub.f32 %v1790_v17, %v790_v33 }
 0x42d   :  { %v787_v37 = vpop.xlane.xlu0 %786 }
 0x42e   :  { %v795_v36 = vmul.f32 1.442695, %v792_v34  ;;  %v791_v38 = vsub.f32 %v775_v19, %v787_v37 }
 0x430   :  { %1860 = vpow2.f32 %v795_v36  ;;  %1010 = vrot.lane.b32.xlu1 %v900_v35, %s1917_s15  ;;  %v793_v41 = vmul.f32 1.442695, %v791_v38 }
 0x432   :  { %1862 = vpow2.f32 %v793_v41 }
 0x43d   :  { %v2148_v39 = vpop.eup %1860 }
 0x43e   :  { %v800_v40 = vsel %vm784_vm10, %v2148_v39, 0.0 }
 0x43f   :  { %801 = vadd.xlane.f32.xlu0 %v800_v40  ;;  %v1863_v43 = vpop.eup %1862 }
 0x440   :  { %v797_v44 = vsel %vm784_vm10, %v1863_v43, 0.0 }
 0x454   :  { %798 = vadd.xlane.f32.xlu1 %v797_v44 }
 0x4a0   :  { %v986_v45 = vpop.xlane.xlu0 %985 }
 0x4a1   :  { %v990_v46 = vsub.f32 %v975_v22, %v986_v45 }
 0x4a3   :  { %v992_v47 = vmul.f32 1.442695, %v990_v46 }
 0x4a4   :  { %v1195_v48 = vpop.xlane.xlu1 %1194  ;;  %v989_v49 = vpop.xlane.xlu0 %988 }
 0x4a5   :  { %1864 = vpow2.f32 %v992_v47  ;;  %v1199_v50 = vsub.f32 %v1184_v25, %v1195_v48  ;;  %v991_v51 = vsub.f32 %v1802_v21, %v989_v49  ;;  %v1518_v49 = vld [vmem:[%s2218_s5 + $0x18] sm:$0xff] }
 0x4a6   :  { %1834 = vmatprep.subr.mxu1 %v1518_v49 }
 0x4a7   :  { %v1201_v52 = vmul.f32 1.442695, %v1199_v50  ;;  %v994_v54 = vmul.f32 1.442695, %v991_v51  ;;  %v1517_v50 = vld [vmem:[%s2218_s5 + $0x10] sm:$0xff]  ;;  %1835 = vmatpush3.msra.mxu1 %v1518_v49  ;;  %v1516_v51 = vld [vmem:[%s2218_s5 + $0x8] sm:$0xff] }
 0x4a8   :  { %v1393_v55 = vpop.xlane.xlu1 %1392  ;;  %v1198_v56 = vpop.xlane.xlu0 %1197  ;;  %1836 = vmatprep.subr.mxu1 %v1517_v50 }
 0x4a9   :  { %1866 = vpow2.f32 %v1201_v52  ;;  %v1200_v57 = vsub.f32 %v1814_v24, %v1198_v56  ;;  %v1397_v10 = vsub.f32 %v2141_v29, %v1393_v55  ;;  %1837 = vmatpush3.msra.mxu1 %v1517_v50  ;;  %v1515_v52 = vld [vmem:[%s2218_s5] sm:$0xff]  ;;  %s1921_s5 = smov [#allocation5]  }
 0x4aa   :  { %1868 = vpow2.f32 %v994_v54  ;;  %1838 = vmatprep.subr.mxu1 %v1516_v51  ;;  %s1607_s22 = sshll.u32 %s1921_s5, 4  ;;  %s1608_s22 = int_to_ptr.vmem [resolvable:$true] %s1607_s22 }
 0x4ab   :  { %v1203_v58 = vmul.f32 1.442695, %v1200_v57  ;;  %v1399_v11 = vmul.f32 1.442695, %v1397_v10  ;;  %1839 = vmatpush3.msra.mxu1 %v1516_v51  ;;  %s1892_s23 = scalar_lea.vmem %s1608_s22, 256  ;;  %p1897_p1 = scmp.lt.s32.totalorder %s1608_s22, %s1608_s22 }
 0x4ac   :  { %v1396_v59 = vpop.xlane.xlu0 %1395  ;;  %v1011_v60 = vpop.permute.xlu1 %1010  ;;  %1840 = vmatprep.subr.mxu1 %v1515_v52  ;;  %p1893_p0 = scmp.ne.s32.totalorder %s1608_s22, %s1892_s23  ;;  %p1898_p2 = scmp.lt.s32.totalorder %s1892_s23, %s1892_s23 }
 0x4ad   :  { %v1398_v61 = vsub.f32 %v1826_v28, %v1396_v59  ;;  %1803 = vmatprep.subr.msk.mxu0 %vm399_vm4, %v1011_v60  ;;  %1870 = vpow2.f32 %v1203_v58  ;;  %v1113_v28 = vld [vmem:[#allocation3 + $0x18] sm:$0xf]  ;;  %1841 = vmatpush3.msra.mxu1 %v1515_v52 }
 0x4ae   :  { %p1899_p3 = por %p1898_p2, %p1897_p1 }
 0x4af   :  { %v1401_v62 = vmul.f32 1.442695, %v1398_v61 }
 0x4b0   :  { %p1900_p4 = pnand %p1899_p3, %p1893_p0 }
 0x4b1   :  { %1872 = vpow2.f32 %v1401_v62 }
 0x4b2   :  { %v1865_v63 = vpop.eup %1864  ;;  %1874 = vpow2.f32 %v1399_v11 }
 0x4b3   :  { %v996_v0 = vsel %vm784_vm10, %v1865_v63, 0.0 }
 0x4b4   :  { %997 = vadd.xlane.f32.xlu1 %v996_v0 }
 0x4b6   :  { %v1867_v1 = vpop.eup %1866 }
 0x4b7   :  { %v1869_v2 = vpop.eup %1868  ;;  %v1205_v3 = vsel %vm784_vm10, %v1867_v1, 0.0 }
 0x4b8   :  { %1206 = vadd.xlane.f32.xlu1 %v1205_v3  ;;  %v999_v4 = vsel %vm784_vm10, %v1869_v2, 0.0 }
 0x4b9   :  { %1000 = vadd.xlane.f32.xlu0 %v999_v4 }
 0x4ba   :  { %v1871_v5 = vpop.eup %1870 }
 0x4bb   :  { %v1208_v6 = vsel %vm784_vm10, %v1871_v5, 0.0 }
 0x4bd   :  { %1209 = vadd.xlane.f32.xlu0 %v1208_v6 }
 0x4be   :  { %v2162_v7 = vpop.eup %1872 }
 0x4bf   :  { %v1406_v8 = vsel %vm784_vm10, %v2162_v7, 0.0  ;;  %v1875_v14 = vpop.eup %1874 }
 0x4c0   :  { %v1403_v17 = vsel %vm784_vm10, %v1875_v14, 0.0 }
 0x4c1   :  { %1407 = vadd.xlane.f32.xlu0 %v1406_v8 }
 0x4c8   :  { %v802_v12 = vpop.xlane.xlu0 %801 }
 0x4c9   :  { %1417 = vrot.lane.b32.xlu1 %v1307_v9, %s1917_s15  ;;  %1876 = vrcp.f32 %v802_v12 }
 0x4d6   :  { %v1877_v15 = vpop.eup %1876 }
 0x4d7   :  { %1008 = vrot.lane.b32.xlu0 %v2096_v53, %s1917_s15  ;;  %v806_v19 = vmul.f32 %v1877_v15, %v2148_v39  ;;  %v1306_v53 = vld [vmem:[#allocation3 + $0x10] sm:$0xff] }
 0x4dd   :  { %v799_v13 = vpop.xlane.xlu1 %798 }
 0x4de   :  { %1878 = vrcp.f32 %v799_v13 }
 0x4eb   :  { %v1879_v16 = vpop.eup %1878 }
 0x4ec   :  { %v804_v18 = vmul.f32 %v1879_v16, %v1863_v43 }
 0x4ed   :  { %1404 = vadd.xlane.f32.xlu1 %v1403_v17 }
 0x4ee   :  { %1795 = vmatprep.mubr.msk.f32.mxu0 %vm784_vm10, %v804_v18 }
 0x4ef   :  { %1796 = vmatmul.mubr.msk.f32.vlgmr.msra.gmra.mxu0 %vm784_vm10, %v806_v19 }
 0x4f0   :  { %1804 = vmatpush3.msk.msra.mxu0 %vm399_vm4, %v1011_v60 }
 0x4fe   :  { %1415 = vrot.lane.b32.xlu1 %v1306_v53, %s1917_s15 }
 0x53d   :  { %v998_v20 = vpop.xlane.xlu1 %997 }
 0x53e   :  { %1880 = vrcp.f32 %v998_v20 }
 0x541   :  { %v1207_v21 = vpop.xlane.xlu1 %1206 }
 0x542   :  { %1882 = vrcp.f32 %v1207_v21  ;;  %v1001_v22 = vpop.xlane.xlu0 %1000 }
 0x543   :  { %1884 = vrcp.f32 %v1001_v22 }
 0x545   :  { %v1418_v35 = vpop.permute.xlu1 %1417 }
 0x546   :  { %v1210_v23 = vpop.xlane.xlu0 %1209 }
 0x547   :  { %1886 = vrcp.f32 %v1210_v23 }
 0x54a   :  { %v1408_v24 = vpop.xlane.xlu0 %1407 }
 0x54b   :  { %v1881_v25 = vpop.eup %1880  ;;  %1888 = vrcp.f32 %v1408_v24 }
 0x54c   :  { %v1003_v26 = vmul.f32 %v1881_v25, %v1865_v63 }
 0x54e   :  { %v1009_v27 = vpop.permute.xlu0 %1008  ;;  %1807 = vmatprep.mubr.msk.f32.mxu0 %vm784_vm10, %v1003_v26 }
 0x54f   :  { %v1883_v29 = vpop.eup %1882  ;;  %1805 = vmatprep.subr.mxu0 %v1009_v27 }
 0x550   :  { %v1885_v30 = vpop.eup %1884  ;;  %1806 = vmatpush3.msra.mxu0 %v1009_v27  ;;  %v1212_v31 = vmul.f32 %v1883_v29, %v1867_v1 }
 0x551   :  { %1815 = vmatprep.subr.msk.mxu0 %vm399_vm4, %v1113_v28  ;;  %v1005_v32 = vmul.f32 %v1885_v30, %v1869_v2 }
 0x553   :  { %1808 = vmatmul.mubr.msk.f32.vlgmr.msra.gmra.mxu0 %vm784_vm10, %v1005_v32 }
 0x554   :  { %v1887_v33 = vpop.eup %1886  ;;  %1816 = vmatpush3.msk.msra.mxu0 %vm399_vm4, %v1113_v28  ;;  %1819 = vmatprep.mubr.msk.f32.mxu0 %vm784_vm10, %v1212_v31 }
 0x555   :  { %1817 = vmatprep.subr.mxu0 %v1306_v53  ;;  %v1214_v34 = vmul.f32 %v1887_v33, %v1871_v5 }
 0x556   :  { %1818 = vmatpush3.msra.mxu0 %v1306_v53 }
 0x557   :  { %1827 = vmatprep.subr.msk.mxu0 %vm399_vm4, %v1418_v35  ;;  %1820 = vmatmul.mubr.msk.f32.vlgmr.msra.gmra.mxu0 %vm784_vm10, %v1214_v34 }
 0x558   :  { %1828 = vmatpush3.msk.msra.mxu0 %vm399_vm4, %v1418_v35  ;;  %v1889_v38 = vpop.eup %1888 }
 0x559   :  { %v1412_v41 = vmul.f32 %v1889_v38, %v2162_v7 }
 0x576   :  { %v1405_v36 = vpop.xlane.xlu1 %1404 }
 0x577   :  { %1890 = vrcp.f32 %v1405_v36 }
 0x57a   :  { %v1416_v37 = vpop.permute.xlu1 %1415 }
 0x57b   :  { %1829 = vmatprep.subr.mxu0 %v1416_v37 }
 0x57c   :  { %1830 = vmatpush3.msra.mxu0 %v1416_v37 }
 0x584   :  { %v1891_v39 = vpop.eup %1890 }
 0x585   :  { %v1410_v40 = vmul.f32 %v1891_v39, %v1875_v14 }
 0x587   :  { %1831 = vmatprep.mubr.msk.f32.mxu0 %vm784_vm10, %v1410_v40 }
 0x588   :  { %1832 = vmatmul.mubr.msk.f32.vlgmr.msra.gmra.mxu0 %vm784_vm10, %v1412_v41 }
 0x5af   :  { %v1797_v42 = vpop.f32.mrf.mxu0 }
 0x5b0   :  { %893 = vrot.lane.b32.xlu0 %v1797_v42, %s1916_s25 }
 0x5b1   :  { %v882_v43 = vpop.f32.mrf.mxu0 }
 0x5b2   :  { %891 = vst.msk [vmem:[#allocation4] sm:$0xff] %vm650_vm8, %v882_v43 }
 0x613   :  { %v1809_v44 = vpop.f32.mrf.mxu0 }
 0x614   :  { %1103 = vrot.lane.b32.xlu1 %v1809_v44, %s1919_s7 }
 0x615   :  { %v1087_v45 = vpop.f32.mrf.mxu0 }
 0x617   :  { %v1821_v46 = vpop.f32.mrf.mxu0 }
 0x618   :  { %1097 = vrot.lane.b32.xlu1 %v1087_v45, %s1920_s4  ;;  %1301 = vrot.lane.b32.xlu0 %v1821_v46, %s1916_s25 }
 0x619   :  { %v1290_v47 = vpop.f32.mrf.mxu0 }
 0x61a   :  { %1299 = vst.msk [vmem:[#allocation4 + $0x8] sm:$0xff] %vm650_vm8, %v1290_v47 }
 0x622   :  { %v894_v48 = vpop.permute.xlu0 %893 }
 0x623   :  { %897 = vst.msk [vmem:[#allocation4] sm:$0xff] %vm896_vm11, %v894_v48 }
 0x648   :  { %v1833_v54 = vpop.f32.mrf.mxu0 }
 0x649   :  { %1509 = vrot.lane.b32.xlu1 %v1833_v54, %s1919_s7 }
 0x64a   :  { %v1494_v55 = vpop.f32.mrf.mxu0 }
 0x64b   :  { %1504 = vrot.lane.b32.xlu0 %v1494_v55, %s1920_s4 }
 0x686   :  { %v1104_v56 = vpop.permute.xlu1 %1103 }
 0x68a   :  { %v1098_v57 = vpop.permute.xlu1 %1097  ;;  %v1302_v58 = vpop.permute.xlu0 %1301 }
 0x68b   :  { %1101 = vst.msk [vmem:[#allocation4] sm:$0xff] %vm1100_vm12, %v1098_v57 }
 0x68c   :  { %1304 = vst.msk [vmem:[#allocation4 + $0x8] sm:$0xff] %vm896_vm11, %v1302_v58 }
 0x68d   :  { %1107 = vst.msk [vmem:[#allocation4] sm:$0xff] %vm1106_vm13, %v1104_v56 }
 0x694   :  { %v1513_v59 = vld [vmem:[#allocation4] sm:$0xff] }
 0x695   :  { %1842 = vmatprep.mubr.msk.f32.mxu1 %vm52_vm0, %v1513_v59 }
 0x6bb   :  { %v1510_v61 = vpop.permute.xlu1 %1509 }
 0x6bd   :  { %v1505_v60 = vpop.permute.xlu0 %1504 }
 0x6be   :  { %1507 = vst.msk [vmem:[#allocation4 + $0x8] sm:$0xff] %vm1100_vm12, %v1505_v60 }
 0x6bf   :  { %1512 = vst.msk [vmem:[#allocation4 + $0x8] sm:$0xff] %vm1106_vm13, %v1510_v61 }
 0x6c6   :  { %v1514_v62 = vld [vmem:[#allocation4 + $0x8] sm:$0xff] }
 0x6c7   :  { %1843 = vmatmul.mubr.msk.f32.vlgmr.msra.gmra.mxu1 %vm52_vm0, %v1514_v62 }
 0x787   :  { %v1844_v63 = vpop.f32.mrf.mxu1 }
 0x788   :  { %1601 = vst.msk [vmem:[#allocation5 + $0x8] sm:$0xff] %vm52_vm0, %v1844_v63 }
 0x789   :  { %v1591_v0 = vpop.f32.mrf.mxu1 }
 0x78a   :  { %1600 = vst.msk [vmem:[#allocation5] sm:$0xff] %vm52_vm0, %v1591_v0 }
 0x78b   :  { %1903 = shalt.err (!%p1900_p4)
}
 0x78c   :  { %s1922_s10 = smov 128  }
 0x78d   :  { %1613 = dma.vmem_to_hbm [thread:$0]  %s1608_s22, 256, %s2225_s12, [#allocation6], %s1922_s10, %s1922_s10, %s1916_s25  }
 0x78e   :  { %1912 = dma.done.wait [#allocation6], 256  }
 0x78f   :  { %1913 = vsyncadd [#allocation6], 4294967040 }
 0x790   :  { %1617 = vsyncpa [#allocation6], 1 }

</bundles_post_ra>
